<compile_context>
chip_gen: v7x
topology: tpu7x:2x2x1
jax: 0.10.0
libtpu: 0.0.40
codegen_flags: <defaults>
</compile_context>

<pallas_src>
import jax
import jax.numpy as jnp
from jax.experimental import pallas as pl
from jax.experimental.pallas import tpu as pltpu

_LANE = 128
_SUBLANE = 8
_F32 = 4  # bytes


def _round_up(n, m):
    return ((n + m - 1) // m) * m


def _vmem_budget_bytes():
    """Generation-aware VMEM budget (v5e/v6e: 128 MiB, v7x: 64 MiB physical)."""
    cap = 64 * 1024 * 1024  # safe default (v7x)
    try:
        info = pltpu.get_tpu_info()
        cap = int(getattr(info, "vmem_capacity_bytes", cap)) or cap
    except Exception:
        pass
    # leave ~25% headroom for Mosaic-internal scratch / semaphores
    return max(16 * 1024 * 1024, (cap * 3) // 4)


def prepare_params(torch_params, *, n_head, d_k, d_v):
    """One-time parameter layout fixup (host/XLA side, weights only):
       * transpose nn.Linear (out, in) weights to (in, out),
       * fold 1/temperature into w_qs,
       * reshape fc to (H, d_v, d_model) for the fused attention epilogue."""
    inv_temp = 1.0 / (float(d_k) ** 0.5)
    d_model = torch_params["w_qs"].shape[1]
    return {
        "w_qs_t": (torch_params["w_qs"] * inv_temp).T,               # (d_model, H*d_k)
        "w_ks_t": torch_params["w_ks"].T,                             # (d_model, H*d_k)
        "w_vs_t": torch_params["w_vs"].T,                             # (d_model, H*d_v)
        "fc_r": torch_params["fc"].T.reshape(n_head, d_v, d_model),   # (H, d_v, d_model)
    }


# ---------------------------------------------------------------------------
# Kernels
# ---------------------------------------------------------------------------

def _linear_kernel(x_ref, w_ref, o_ref):
    o_ref[...] = jnp.dot(x_ref[...], w_ref[...],
                         preferred_element_type=jnp.float32).astype(o_ref.dtype)


def _qkv_proj_kernel(xq_ref, xk_ref, xv_ref, wq_ref, wk_ref, wv_ref,
                     oq_ref, ok_ref, ov_ref):
    # One grid step projects the same row-tile through all three resident weights.
    oq_ref[...] = jnp.dot(xq_ref[...], wq_ref[...],
                          preferred_element_type=jnp.float32).astype(oq_ref.dtype)
    ok_ref[...] = jnp.dot(xk_ref[...], wk_ref[...],
                          preferred_element_type=jnp.float32).astype(ok_ref.dtype)
    ov_ref[...] = jnp.dot(xv_ref[...], wv_ref[...],
                          preferred_element_type=jnp.float32).astype(ov_ref.dtype)


def _attn_fc_kernel(q_ref, k_ref, v_ref, fc_ref, o_ref, a_ref=None):
    # q_ref: (1, tq, H, d_k)   k_ref: (1, Lk, H, d_k)   v_ref: (1, Lk, H, d_v)
    # fc_ref: (H, d_v, d_model)  o_ref: (1, tq, d_model)  a_ref: (1, H, tq, Lk)
    q = q_ref[0]   # (tq, H, d_k); already carries the 1/temperature scale via w_qs
    k = k_ref[0]   # (Lk, H, d_k)
    v = v_ref[0]   # (Lk, H, d_v)

    # All heads in one batched contraction -> (H, tq, Lk).
    s = jnp.einsum("qhd,khd->hqk", q, k, preferred_element_type=jnp.float32)
    s = s - jnp.max(s, axis=-1, keepdims=True)
    e = jnp.exp(s)
    p = e / jnp.sum(e, axis=-1, keepdims=True)   # exact softmax (PyTorch parity)

    if a_ref is not None:
        a_ref[0] = p.astype(a_ref.dtype)         # single lane-dense full-block store

    # Context for all heads: (H, tq, d_v).
    ctx = jnp.einsum("hqk,khd->hqd", p.astype(v.dtype), v,
                     preferred_element_type=jnp.float32)
    # Fused fc epilogue: per-head partial projections, summed over heads (VPU adds).
    out_h = jnp.einsum("hqd,hdm->hqm", ctx.astype(fc_ref.dtype), fc_ref[...],
                       preferred_element_type=jnp.float32)         # (H, tq, d_model)
    o_ref[0] = jnp.sum(out_h, axis=0).astype(o_ref.dtype)          # single full store


# ---------------------------------------------------------------------------
# VMEM footprint model + tile pickers
# ---------------------------------------------------------------------------

def _attn_footprint_bytes(tq, Lk, H, d_k, d_v, d_model):
    q_blk = 2 * tq * _round_up(H, _SUBLANE) * _round_up(d_k, _LANE)
    k_blk = 2 * Lk * _round_up(H, _SUBLANE) * _round_up(d_k, _LANE)
    v_blk = 2 * Lk * _round_up(H, _SUBLANE) * _round_up(d_v, _LANE)
    fc_blk = 2 * H * _round_up(d_v, _SUBLANE) * _round_up(d_model, _LANE)
    o_blk = 2 * _round_up(tq, _SUBLANE) * _round_up(d_model, _LANE)
    a_blk = 2 * H * _round_up(tq, _SUBLANE) * _round_up(Lk, _LANE)
    tmps = 4 * H * _round_up(tq, _SUBLANE) * _round_up(Lk, _LANE)   # s / e / p values
    return (q_blk + k_blk + v_blk + fc_blk + o_blk + a_blk + tmps) * _F32


def _pick_tq(Lq, Lk, H, d_k, d_v, d_model, budget):
    cands = [c for c in (Lq, 2048, 1024, 512, 256, 128, 64, 32, 16, 8)
             if c <= Lq and (c == Lq or c % _SUBLANE == 0)]
    for tq in cands:
        if _attn_footprint_bytes(tq, Lk, H, d_k, d_v, d_model) <= budget:
            return tq
    # TODO(synk): add flash-style key (Lk) tiling for sequences whose resident
    # K/V + attention-prob block do not fit VMEM even at tq = 8.
    return cands[-1] if cands else Lq


def _proj_footprint_bytes(tm, K, n_cols_list):
    w = sum(2 * _round_up(K, _SUBLANE) * _round_up(n, _LANE) for n in n_cols_list)
    x = len(n_cols_list) * 2 * _round_up(tm, _SUBLANE) * _round_up(K, _LANE)
    o = sum(2 * _round_up(tm, _SUBLANE) * _round_up(n, _LANE) for n in n_cols_list)
    return (w + x + o) * _F32


def _pick_tm(M, K, n_cols_list, budget):
    cands = [c for c in (M, 2048, 1024, 512, 256, 128, 64, 32, 16, 8)
             if c <= M and (c == M or c % _SUBLANE == 0)]
    for tm in cands:
        if _proj_footprint_bytes(tm, K, n_cols_list) <= budget:
            return tm
    return cands[-1] if cands else M


# ---------------------------------------------------------------------------
# Wrappers
# ---------------------------------------------------------------------------

def linear_nobias(x2d, w_t, *, budget=None):
    """x2d: (M, K); w_t: (K, N) pre-transposed weight. Returns (M, N)."""
    M, K = x2d.shape
    N = w_t.shape[1]
    budget = budget if budget is not None else _vmem_budget_bytes()
    tm = _pick_tm(M, K, [N], budget)
    return pl.pallas_call(
        _linear_kernel,
        out_shape=jax.ShapeDtypeStruct((M, N), x2d.dtype),
        grid=(pl.cdiv(M, tm),),
        in_specs=[
            pl.BlockSpec((tm, K), lambda i: (i, 0)),
            pl.BlockSpec((K, N), lambda i: (0, 0)),      # weight resident
        ],
        out_specs=pl.BlockSpec((tm, N), lambda i: (i, 0)),
        compiler_params=pltpu.CompilerParams(
            dimension_semantics=("parallel",),
            vmem_limit_bytes=budget),
    )(x2d, w_t)


def qkv_projection(xq, xk, xv, wq_t, wk_t, wv_t, *, budget=None):
    """Fused Q/K/V projections: one pipelined launch, all three weights resident.
       xq/xk/xv: (M, K); wq_t/wk_t: (K, H*d_k); wv_t: (K, H*d_v)."""
    M, K = xq.shape
    Nq = wq_t.shape[1]
    Nv = wv_t.shape[1]
    budget = budget if budget is not None else _vmem_budget_bytes()
    tm = _pick_tm(M, K, [Nq, Nq, Nv], budget)
    # TODO(synk): single-buffer the grid-invariant weight blocks
    # (pipeline_mode=pl.Buffered(1)) to halve resident-weight VMEM cost.
    return pl.pallas_call(
        _qkv_proj_kernel,
        out_shape=(jax.ShapeDtypeStruct((M, Nq), xq.dtype),
                   jax.ShapeDtypeStruct((M, Nq), xk.dtype),
                   jax.ShapeDtypeStruct((M, Nv), xv.dtype)),
        grid=(pl.cdiv(M, tm),),
        in_specs=[
            pl.BlockSpec((tm, K), lambda i: (i, 0)),
            pl.BlockSpec((tm, K), lambda i: (i, 0)),
            pl.BlockSpec((tm, K), lambda i: (i, 0)),
            pl.BlockSpec((K, Nq), lambda i: (0, 0)),     # weights resident
            pl.BlockSpec((K, Nq), lambda i: (0, 0)),
            pl.BlockSpec((K, Nv), lambda i: (0, 0)),
        ],
        out_specs=(
            pl.BlockSpec((tm, Nq), lambda i: (i, 0)),
            pl.BlockSpec((tm, Nq), lambda i: (i, 0)),
            pl.BlockSpec((tm, Nv), lambda i: (i, 0)),
        ),
        compiler_params=pltpu.CompilerParams(
            dimension_semantics=("parallel",),
            vmem_limit_bytes=budget),
    )(xq, xk, xv, wq_t, wk_t, wv_t)


def attention_fc(q4, k4, v4, fc_r, *, return_attn=True, attn_dtype=None, budget=None):
    """q4: (B, Lq, H, d_k) (already 1/temperature-scaled); k4: (B, Lk, H, d_k);
       v4: (B, Lk, H, d_v); fc_r: (H, d_v, d_model).
       Returns (out (B, Lq, d_model), attn (B, H, Lq, Lk) or None)."""
    B, Lq, H, d_k = q4.shape
    Lk = k4.shape[1]
    d_v = v4.shape[3]
    d_model = fc_r.shape[2]
    budget = budget if budget is not None else _vmem_budget_bytes()
    tq = _pick_tq(Lq, Lk, H, d_k, d_v, d_model, budget)
    attn_dtype = attn_dtype or q4.dtype

    out_shape = [jax.ShapeDtypeStruct((B, Lq, d_model), q4.dtype)]
    out_specs = [pl.BlockSpec((1, tq, d_model), lambda b, qi: (b, qi, 0))]
    if return_attn:
        out_shape.append(jax.ShapeDtypeStruct((B, H, Lq, Lk), attn_dtype))
        out_specs.append(pl.BlockSpec((1, H, tq, Lk), lambda b, qi: (b, 0, qi, 0)))

    res = pl.pallas_call(
        _attn_fc_kernel,
        out_shape=tuple(out_shape),
        grid=(B, pl.cdiv(Lq, tq)),
        in_specs=[
            pl.BlockSpec((1, tq, H, d_k), lambda b, qi: (b, qi, 0, 0)),
            pl.BlockSpec((1, Lk, H, d_k), lambda b, qi: (b, 0, 0, 0)),   # K resident per batch
            pl.BlockSpec((1, Lk, H, d_v), lambda b, qi: (b, 0, 0, 0)),   # V resident per batch
            pl.BlockSpec((H, d_v, d_model), lambda b, qi: (0, 0, 0)),    # fc resident
        ],
        out_specs=tuple(out_specs),
        compiler_params=pltpu.CompilerParams(
            dimension_semantics=("parallel", "parallel"),
            vmem_limit_bytes=budget),
    )(q4, k4, v4, fc_r)
    if return_attn:
        return res[0], res[1]
    return res[0], None


def multi_head_attention(q_in, k_in, v_in, params, *, n_head, d_k, d_v,
                         return_attn=True, attn_dtype=None):
    """q_in/k_in/v_in: (B, L, d_model); params from prepare_params().
       Returns (out (B, Lq, d_model), attn (B, H, Lq, Lk)) like the PyTorch module."""
    B, Lq, Dm = q_in.shape
    Lk = k_in.shape[1]
    Lv = v_in.shape[1]
    budget = _vmem_budget_bytes()

    xq = q_in.reshape(B * Lq, Dm)
    xk = k_in.reshape(B * Lk, Dm)
    xv = v_in.reshape(B * Lv, Dm)

    wq_t, wk_t, wv_t = params["w_qs_t"], params["w_ks_t"], params["w_vs_t"]
    fused_w_bytes = _proj_footprint_bytes(
        _SUBLANE, Dm, [wq_t.shape[1], wk_t.shape[1], wv_t.shape[1]])
    if Lq == Lk == Lv and fused_w_bytes <= budget:
        qp, kp, vp = qkv_projection(xq, xk, xv, wq_t, wk_t, wv_t, budget=budget)
    else:
        # mismatched lengths, or 3 resident (double-buffered) weights overflow VMEM
        qp = linear_nobias(xq, wq_t, budget=budget)
        kp = linear_nobias(xk, wk_t, budget=budget)
        vp = linear_nobias(xv, wv_t, budget=budget)

    # Contiguous (free) reshapes: (B*L, H*d) -> (B, L, H, d); no HBM transpose.
    q4 = qp.reshape(B, Lq, n_head, d_k)
    k4 = kp.reshape(B, Lk, n_head, d_k)
    v4 = vp.reshape(B, Lv, n_head, d_v)

    return attention_fc(q4, k4, v4, params["fc_r"],
                        return_attn=return_attn, attn_dtype=attn_dtype,
                        budget=budget)


# ---------------------------------------------------------------------------
# Pure-JAX reference (mirrors the PyTorch module) + main
# ---------------------------------------------------------------------------

def _reference(q_in, k_in, v_in, torch_params, *, n_head, d_k, d_v):
    temp = float(d_k) ** 0.5
    B, Lq, _ = q_in.shape
    Lk = k_in.shape[1]
    q = (q_in @ torch_params["w_qs"].T).reshape(B, Lq, n_head, d_k).transpose(0, 2, 1, 3)
    k = (k_in @ torch_params["w_ks"].T).reshape(B, Lk, n_head, d_k).transpose(0, 2, 1, 3)
    v = (v_in @ torch_params["w_vs"].T).reshape(B, Lk, n_head, d_v).transpose(0, 2, 1, 3)
    s = jnp.einsum("bhqd,bhkd->bhqk", q, k) / temp
    attn = jax.nn.softmax(s, axis=-1)
    ctx = jnp.einsum("bhqk,bhkd->bhqd", attn, v)
    ctx = ctx.transpose(0, 2, 1, 3).reshape(B, Lq, n_head * d_v)
    out = ctx @ torch_params["fc"].T
    return out, attn


if __name__ == "__main__":
    n_head, d_model, d_k, d_v = 2, 32, 16, 16
    B, L = 2, 8

    key = jax.random.PRNGKey(0)
    k_qs, k_ks, k_vs, k_fc, k_q, k_k, k_v = jax.random.split(key, 7)

    # deterministic synthetic parameters, PyTorch nn.Linear weight layout (out, in)
    torch_params = {
        "w_qs": jax.random.normal(k_qs, (n_head * d_k, d_model), jnp.float32) * 0.05,
        "w_ks": jax.random.normal(k_ks, (n_head * d_k, d_model), jnp.float32) * 0.05,
        "w_vs": jax.random.normal(k_vs, (n_head * d_v, d_model), jnp.float32) * 0.05,
        "fc":   jax.random.normal(k_fc, (d_model, n_head * d_v), jnp.float32) * 0.05,
    }
    params = prepare_params(torch_params, n_head=n_head, d_k=d_k, d_v=d_v)

    q_in = jax.random.normal(k_q, (B, L, d_model), jnp.float32)
    k_in = jax.random.normal(k_k, (B, L, d_model), jnp.float32)
    v_in = jax.random.normal(k_v, (B, L, d_model), jnp.float32)

    out, attn = multi_head_attention(
        q_in, k_in, v_in, params, n_head=n_head, d_k=d_k, d_v=d_v)
    jax.block_until_ready((out, attn))

    assert out.shape == (B, L, d_model)
    assert attn.shape == (B, n_head, L, L)

    ref_out, ref_attn = _reference(q_in, k_in, v_in, torch_params,
                                   n_head=n_head, d_k=d_k, d_v=d_v)
    assert jnp.allclose(out, ref_out, atol=1e-4, rtol=1e-4), "output mismatch vs reference"
    assert jnp.allclose(attn, ref_attn, atol=1e-4, rtol=1e-4), "attn mismatch vs reference"
    print("KERNEL_OK")
</pallas_src>

<mosaic_0001>
module attributes {stable_mosaic.version = 11 : i64} {
  func.func @_qkv_proj_kernel(%arg0: i32, %arg1: memref<16x32xf32, #tpu.memory_space<vmem>>, %arg2: memref<16x32xf32, #tpu.memory_space<vmem>>, %arg3: memref<16x32xf32, #tpu.memory_space<vmem>>, %arg4: memref<32x32xf32, #tpu.memory_space<vmem>>, %arg5: memref<32x32xf32, #tpu.memory_space<vmem>>, %arg6: memref<32x32xf32, #tpu.memory_space<vmem>>, %arg7: memref<16x32xf32, #tpu.memory_space<vmem>>, %arg8: memref<16x32xf32, #tpu.memory_space<vmem>>, %arg9: memref<16x32xf32, #tpu.memory_space<vmem>>) attributes {dimension_semantics = [#tpu.dimension_semantics<parallel>], iteration_bounds = array<i64: 1>, scalar_prefetch = 0 : i64, scratch_operands = 0 : i64, tpu.core_type = #tpu.core_type<tc>, window_params = [{transform_indices = @transform_0, window_bounds = array<i64: 16, 32>}, {transform_indices = @transform_1, window_bounds = array<i64: 16, 32>}, {transform_indices = @transform_2, window_bounds = array<i64: 16, 32>}, {pipeline_mode = #tpu.pipeline_mode<synchronous>, transform_indices = @transform_3, window_bounds = array<i64: 32, 32>}, {pipeline_mode = #tpu.pipeline_mode<synchronous>, transform_indices = @transform_4, window_bounds = array<i64: 32, 32>}, {pipeline_mode = #tpu.pipeline_mode<synchronous>, transform_indices = @transform_5, window_bounds = array<i64: 32, 32>}, {transform_indices = @transform_6, window_bounds = array<i64: 16, 32>}, {transform_indices = @transform_7, window_bounds = array<i64: 16, 32>}, {transform_indices = @transform_8, window_bounds = array<i64: 16, 32>}]} {
    %c0 = arith.constant 0 : index
    %c0_0 = arith.constant 0 : index
    %0 = vector.load %arg1[%c0, %c0_0] : memref<16x32xf32, #tpu.memory_space<vmem>>, vector<16x32xf32>
    %c0_1 = arith.constant 0 : index
    %c0_2 = arith.constant 0 : index
    %1 = vector.load %arg4[%c0_1, %c0_2] : memref<32x32xf32, #tpu.memory_space<vmem>>, vector<32x32xf32>
    %cst = arith.constant dense<0.000000e+00> : vector<16x32xf32>
    %2 = tpu.matmul %0, %1, %cst {dimension_numbers = #tpu.dot_dimension_numbers<[1], [0], [0], [1], [0, 0, 1, 1], [], []>} : vector<16x32xf32>, vector<32x32xf32>, vector<16x32xf32> -> vector<16x32xf32>
    %c0_3 = arith.constant 0 : index
    %c0_4 = arith.constant 0 : index
    %3 = vector.load %arg7[%c0_3, %c0_4] : memref<16x32xf32, #tpu.memory_space<vmem>>, vector<16x32xf32>
    tpu.vector_store %arg7[%c0_3, %c0_4], %2 {strides = array<i32>} : memref<16x32xf32, #tpu.memory_space<vmem>>, vector<16x32xf32>,
    %c0_5 = arith.constant 0 : index
    %c0_6 = arith.constant 0 : index
    %4 = vector.load %arg2[%c0_5, %c0_6] : memref<16x32xf32, #tpu.memory_space<vmem>>, vector<16x32xf32>
    %c0_7 = arith.constant 0 : index
    %c0_8 = arith.constant 0 : index
    %5 = vector.load %arg5[%c0_7, %c0_8] : memref<32x32xf32, #tpu.memory_space<vmem>>, vector<32x32xf32>
    %cst_9 = arith.constant dense<0.000000e+00> : vector<16x32xf32>
    %6 = tpu.matmul %4, %5, %cst_9 {dimension_numbers = #tpu.dot_dimension_numbers<[1], [0], [0], [1], [0, 0, 1, 1], [], []>} : vector<16x32xf32>, vector<32x32xf32>, vector<16x32xf32> -> vector<16x32xf32>
    %c0_10 = arith.constant 0 : index
    %c0_11 = arith.constant 0 : index
    %7 = vector.load %arg8[%c0_10, %c0_11] : memref<16x32xf32, #tpu.memory_space<vmem>>, vector<16x32xf32>
    tpu.vector_store %arg8[%c0_10, %c0_11], %6 {strides = array<i32>} : memref<16x32xf32, #tpu.memory_space<vmem>>, vector<16x32xf32>,
    %c0_12 = arith.constant 0 : index
    %c0_13 = arith.constant 0 : index
    %8 = vector.load %arg3[%c0_12, %c0_13] : memref<16x32xf32, #tpu.memory_space<vmem>>, vector<16x32xf32>
    %c0_14 = arith.constant 0 : index
    %c0_15 = arith.constant 0 : index
    %9 = vector.load %arg6[%c0_14, %c0_15] : memref<32x32xf32, #tpu.memory_space<vmem>>, vector<32x32xf32>
    %cst_16 = arith.constant dense<0.000000e+00> : vector<16x32xf32>
    %10 = tpu.matmul %8, %9, %cst_16 {dimension_numbers = #tpu.dot_dimension_numbers<[1], [0], [0], [1], [0, 0, 1, 1], [], []>} : vector<16x32xf32>, vector<32x32xf32>, vector<16x32xf32> -> vector<16x32xf32>
    %c0_17 = arith.constant 0 : index
    %c0_18 = arith.constant 0 : index
    %11 = vector.load %arg9[%c0_17, %c0_18] : memref<16x32xf32, #tpu.memory_space<vmem>>, vector<16x32xf32>
    tpu.vector_store %arg9[%c0_17, %c0_18], %10 {strides = array<i32>} : memref<16x32xf32, #tpu.memory_space<vmem>>, vector<16x32xf32>,
    return
  }
  func.func @transform_0(%arg0: i32) -> (i32, i32) {
    %c0_i32 = arith.constant 0 : i32
    %c0_i32_0 = arith.constant 0 : i32
    return %arg0, %c0_i32 : i32, i32
  }
  func.func @transform_1(%arg0: i32) -> (i32, i32) {
    %c0_i32 = arith.constant 0 : i32
    %c0_i32_0 = arith.constant 0 : i32
    return %arg0, %c0_i32 : i32, i32
  }
  func.func @transform_2(%arg0: i32) -> (i32, i32) {
    %c0_i32 = arith.constant 0 : i32
    %c0_i32_0 = arith.constant 0 : i32
    return %arg0, %c0_i32 : i32, i32
  }
  func.func @transform_3(%arg0: i32) -> (i32, i32) {
    %c0_i32 = arith.constant 0 : i32
    %c0_i32_0 = arith.constant 0 : i32
    %c0_i32_1 = arith.constant 0 : i32
    return %c0_i32, %c0_i32_0 : i32, i32
  }
  func.func @transform_4(%arg0: i32) -> (i32, i32) {
    %c0_i32 = arith.constant 0 : i32
    %c0_i32_0 = arith.constant 0 : i32
    %c0_i32_1 = arith.constant 0 : i32
    return %c0_i32, %c0_i32_0 : i32, i32
  }
  func.func @transform_5(%arg0: i32) -> (i32, i32) {
    %c0_i32 = arith.constant 0 : i32
    %c0_i32_0 = arith.constant 0 : i32
    %c0_i32_1 = arith.constant 0 : i32
    return %c0_i32, %c0_i32_0 : i32, i32
  }
  func.func @transform_6(%arg0: i32) -> (i32, i32) {
    %c0_i32 = arith.constant 0 : i32
    %c0_i32_0 = arith.constant 0 : i32
    return %arg0, %c0_i32 : i32, i32
  }
  func.func @transform_7(%arg0: i32) -> (i32, i32) {
    %c0_i32 = arith.constant 0 : i32
    %c0_i32_0 = arith.constant 0 : i32
    return %arg0, %c0_i32 : i32, i32
  }
  func.func @transform_8(%arg0: i32) -> (i32, i32) {
    %c0_i32 = arith.constant 0 : i32
    %c0_i32_0 = arith.constant 0 : i32
    return %arg0, %c0_i32 : i32, i32
  }
}

</mosaic_0001>

<bundles_post_ra>
// kernel: tpu_custom_call.1
= control target key start
LH: loop header
LB: loop body
LE: loop exit
PB: predicated region body
PF: predicated region fallthrough
CT: control target
= control target key end

     0   :  { %14 = vsyncpa [#allocation3], 0  ;;  %s962_s0 = inlined_call_operand.hbm [shape: f32[16,32], index: 0, kind: input, shape index: {}]   ;;  %s963_s1 = inlined_call_operand.hbm [shape: f32[16,32], index: 1, kind: input, shape index: {}]   ;;  %s964_s2 = inlined_call_operand.hbm [shape: f32[16,32], index: 2, kind: input, shape index: {}]   ;;  %s965_s3 = inlined_call_operand.hbm [shape: f32[32,32], index: 3, kind: input, shape index: {}]   ;;  %s966_s4 = inlined_call_operand.hbm [shape: f32[32,32], index: 4, kind: input, shape index: {}]   ;;  %s967_s5 = inlined_call_operand.hbm [shape: f32[32,32], index: 5, kind: input, shape index: {}]   ;;  %s968_s6 = inlined_call_operand.hbm [shape: f32[16,32], index: 6, kind: output, shape index: {0}]   ;;  %s969_s7 = inlined_call_operand.hbm [shape: f32[16,32], index: 7, kind: output, shape index: {1}]   ;;  %s970_s8 = inlined_call_operand.hbm [shape: f32[16,32], index: 8, kind: output, shape index: {2}]  }
   0x1   :  { %15 = vsyncpa [#allocation6], 0 }
   0x2   :  { %16 = vsyncpa [#allocation9], 0 }
   0x3   :  { %17 = vsyncpa [#allocation12], 0 }
   0x4   :  { %18 = vsyncpa [#allocation4], 0 }
   0x5   :  { %19 = vsyncpa [#allocation15], 0  ;;  %s731_s27 = smov [#allocation5]   ;;  %s732_s29 = smov [#allocation8]  }
   0x6   :  { %s37_s28 = sshll.u32 %s731_s27, 4  ;;  %s61_s30 = sshll.u32 %s732_s29, 4  ;;  %s38_s28 = int_to_ptr.vmem [resolvable:$true] %s37_s28  ;;  %s787_s30 = int_to_ptr.vmem [resolvable:$true] %s61_s30 }
   0x7   :  { %s521_s11 = scalar_lea.hbm %s963_s1, 256 }
   0x8   :  { %p522_p0 = scmp.ne.s32.totalorder %s963_s1, %s521_s11  ;;  %p525_p1 = scmp.lt.u32.totalorder %s521_s11, %s963_s1 }
   0xa   :  { %p527_p2 = pnand %p525_p1, %p522_p0 }
   0xc   :  { %530 = shalt.err (!%p527_p2)
}
   0xd   :  { %s531_s16 = scalar_lea.vmem %s38_s28, 256  ;;  %p536_p4 = scmp.lt.s32.totalorder %s38_s28, %s38_s28 }
   0xe   :  { %p532_p3 = scmp.ne.s32.totalorder %s38_s28, %s531_s16  ;;  %p537_p5 = scmp.lt.s32.totalorder %s531_s16, %s531_s16 }
  0x10   :  { %p538_p6 = por %p537_p5, %p536_p4 }
  0x12   :  { %p539_p7 = pnand %p538_p6, %p532_p3 }
  0x14   :  { %542 = shalt.err (!%p539_p7)
}
  0x15   :  { %s733_s17 = smov 128   ;;  %s734_s18 = smov 8  }
  0x16   :  { %43 = dma.hbm_to_vmem [thread:$0]  %s963_s1, 256, %s38_s28, [#allocation6], %s733_s17, %s733_s17, %s734_s18  }
  0x17   :  { %s543_s23 = scalar_lea.hbm %s965_s3, 512 }
  0x18   :  { %p544_p8 = scmp.ne.s32.totalorder %s965_s3, %s543_s23  ;;  %p547_p9 = scmp.lt.u32.totalorder %s543_s23, %s965_s3 }
  0x1a   :  { %p549_p10 = pnand %p547_p9, %p544_p8 }
  0x1c   :  { %552 = shalt.err (!%p549_p10)
}
  0x1d   :  { %s553_s29 = scalar_lea.vmem %s787_s30, 512  ;;  %p558_p12 = scmp.lt.s32.totalorder %s787_s30, %s787_s30 }
  0x1e   :  { %p554_p11 = scmp.ne.s32.totalorder %s787_s30, %s553_s29  ;;  %p559_p13 = scmp.lt.s32.totalorder %s553_s29, %s553_s29 }
  0x20   :  { %p560_p0 = por %p559_p13, %p558_p12 }
  0x22   :  { %p561_p1 = pnand %p560_p0, %p554_p11 }
  0x24   :  { %564 = shalt.err (!%p561_p1)
}
  0x25   :  { %67 = dma.hbm_to_vmem [thread:$0]  %s965_s3, 512, %s787_s30, [#allocation9], %s733_s17, %s733_s17, %s734_s18  }
  0x26   :  { %s735_s9 = smov [#allocation2]   ;;  %s736_s11 = smov [#allocation7]  }
  0x27   :  { %s25_s10 = sshll.u32 %s735_s9, 4  ;;  %s49_s12 = sshll.u32 %s736_s11, 4  ;;  %s26_s10 = int_to_ptr.vmem [resolvable:$true] %s25_s10  ;;  %s824_s12 = int_to_ptr.vmem [resolvable:$true] %s49_s12 }
  0x28   :  { %s565_s15 = scalar_lea.hbm %s962_s0, 256 }
  0x29   :  { %p566_p2 = scmp.ne.s32.totalorder %s962_s0, %s565_s15  ;;  %p569_p3 = scmp.lt.u32.totalorder %s565_s15, %s962_s0 }
  0x2b   :  { %p571_p4 = pnand %p569_p3, %p566_p2 }
  0x2d   :  { %574 = shalt.err (!%p571_p4)
}
  0x2e   :  { %s575_s3 = scalar_lea.vmem %s26_s10, 256  ;;  %p580_p6 = scmp.lt.s32.totalorder %s26_s10, %s26_s10 }
  0x2f   :  { %p576_p5 = scmp.ne.s32.totalorder %s26_s10, %s575_s3  ;;  %p581_p7 = scmp.lt.s32.totalorder %s575_s3, %s575_s3 }
  0x31   :  { %p582_p8 = por %p581_p7, %p580_p6 }
  0x33   :  { %p583_p9 = pnand %p582_p8, %p576_p5 }
  0x35   :  { %586 = shalt.err (!%p583_p9)
}
  0x36   :  { %31 = dma.hbm_to_vmem [thread:$0]  %s962_s0, 256, %s26_s10, [#allocation3], %s733_s17, %s733_s17, %s734_s18  }
  0x37   :  { %s587_s25 = scalar_lea.hbm %s964_s2, 256 }
  0x38   :  { %p588_p10 = scmp.ne.s32.totalorder %s964_s2, %s587_s25  ;;  %p591_p11 = scmp.lt.u32.totalorder %s587_s25, %s964_s2 }
  0x3a   :  { %p593_p12 = pnand %p591_p11, %p588_p10 }
  0x3c   :  { %596 = shalt.err (!%p593_p12)
}
  0x3d   :  { %s597_s28 = scalar_lea.vmem %s824_s12, 256  ;;  %p602_p0 = scmp.lt.s32.totalorder %s824_s12, %s824_s12 }
  0x3e   :  { %p598_p13 = scmp.ne.s32.totalorder %s824_s12, %s597_s28  ;;  %p603_p1 = scmp.lt.s32.totalorder %s597_s28, %s597_s28 }
  0x40   :  { %p604_p2 = por %p603_p1, %p602_p0 }
  0x42   :  { %p605_p3 = pnand %p604_p2, %p598_p13 }
  0x44   :  { %608 = shalt.err (!%p605_p3)
}
  0x45   :  { %55 = dma.hbm_to_vmem [thread:$0]  %s964_s2, 256, %s824_s12, [#allocation6], %s733_s17, %s733_s17, %s734_s18  }
  0x46   :  { %s737_s10 = smov [#allocation10]   ;;  %s738_s13 = smov [#allocation11]  }
  0x47   :  { %s73_s11 = sshll.u32 %s737_s10, 4  ;;  %s85_s14 = sshll.u32 %s738_s13, 4  ;;  %s74_s11 = int_to_ptr.vmem [resolvable:$true] %s73_s11  ;;  %s861_s14 = int_to_ptr.vmem [resolvable:$true] %s85_s14 }
  0x48   :  { %s609_s19 = scalar_lea.hbm %s966_s4, 512 }
  0x49   :  { %p610_p4 = scmp.ne.s32.totalorder %s966_s4, %s609_s19  ;;  %p613_p5 = scmp.lt.u32.totalorder %s609_s19, %s966_s4 }
  0x4b   :  { %p615_p6 = pnand %p613_p5, %p610_p4 }
  0x4d   :  { %618 = shalt.err (!%p615_p6)
}
  0x4e   :  { %s619_s2 = scalar_lea.vmem %s74_s11, 512  ;;  %p624_p8 = scmp.lt.s32.totalorder %s74_s11, %s74_s11 }
  0x4f   :  { %p620_p7 = scmp.ne.s32.totalorder %s74_s11, %s619_s2  ;;  %p625_p9 = scmp.lt.s32.totalorder %s619_s2, %s619_s2 }
  0x51   :  { %p626_p10 = por %p625_p9, %p624_p8 }
  0x53   :  { %p627_p11 = pnand %p626_p10, %p620_p7 }
  0x55   :  { %630 = shalt.err (!%p627_p11)
}
  0x56   :  { %79 = dma.hbm_to_vmem [thread:$0]  %s966_s4, 512, %s74_s11, [#allocation9], %s733_s17, %s733_s17, %s734_s18  }
  0x57   :  { %s631_s25 = scalar_lea.hbm %s967_s5, 512 }
  0x58   :  { %p632_p12 = scmp.ne.s32.totalorder %s967_s5, %s631_s25  ;;  %p635_p13 = scmp.lt.u32.totalorder %s631_s25, %s967_s5 }
  0x5a   :  { %p637_p0 = pnand %p635_p13, %p632_p12 }
  0x5c   :  { %640 = shalt.err (!%p637_p0)
}
  0x5d   :  { %s641_s28 = scalar_lea.vmem %s861_s14, 512  ;;  %p646_p2 = scmp.lt.s32.totalorder %s861_s14, %s861_s14 }
  0x5e   :  { %p642_p1 = scmp.ne.s32.totalorder %s861_s14, %s641_s28  ;;  %p647_p3 = scmp.lt.s32.totalorder %s641_s28, %s641_s28 }
  0x60   :  { %p648_p4 = por %p647_p3, %p646_p2 }
  0x62   :  { %p649_p5 = pnand %p648_p4, %p642_p1 }
  0x64   :  { %652 = shalt.err (!%p649_p5)
}
  0x65   :  { %91 = dma.hbm_to_vmem [thread:$0]  %s967_s5, 512, %s861_s14, [#allocation12], %s733_s17, %s733_s17, %s734_s18  }
  0x66   :  { %719 = dma.done.wait [#allocation3], 256  }
  0x67   :  { %720 = vsyncadd [#allocation3], 4294967040 }
  0x68   :  { %721 = dma.done.wait [#allocation6], 512  }
  0x69   :  { %722 = vsyncadd [#allocation6], 4294966784 }
  0x6a   :  { %723 = dma.done.wait [#allocation9], 1024  }
  0x6b   :  { %724 = vsyncadd [#allocation9], 4294966272 }
  0x6c   :  { %725 = dma.done.wait [#allocation12], 512  }
  0x6d   :  { %726 = vsyncadd [#allocation12], 4294966784  ;;  %v112_v0 = vld [vmem:[#allocation8] sm:$0xff]  ;;  %v113_v1 = vld [vmem:[#allocation8 + $0x8] sm:$0xff]  ;;  %vm116_vm0 = vcmask 261120   ;;  %s739_s5 = smov [#allocation13]  }
  0x6e   :  { %v114_v2 = vld [vmem:[#allocation8 + $0x10] sm:$0xff]  ;;  %v486_v3 = vpack.c.bf16 %v113_v1, %v112_v0  ;;  %v115_v4 = vld [vmem:[#allocation8 + $0x18] sm:$0xff]  ;;  %v202_v5 = vld [vmem:[#allocation10] sm:$0xff]  ;;  %s383_s9 = sshll.u32 %s739_s5, 4  ;;  %s740_s10 = smov [#allocation14]   ;;  %s384_s9 = int_to_ptr.vmem [resolvable:$true] %s383_s9 }
  0x6f   :  { %v203_v6 = vld [vmem:[#allocation10 + $0x8] sm:$0xff]  ;;  %v490_v7 = vpack.c.bf16 %v115_v4, %v114_v2  ;;  %v110_v9 = vld [vmem:[#allocation2] sm:$0xff]  ;;  %v291_v10 = vld [vmem:[#allocation11] sm:$0xff]  ;;  %s395_s11 = sshll.u32 %s740_s10, 4  ;;  %s653_s13 = scalar_lea.vmem %s384_s9, 256  ;;  %s905_s11 = int_to_ptr.vmem [resolvable:$true] %s395_s11 }
  0x70   :  { %v494_v8 = vpack.c.bf16 %v203_v6, %v202_v5  ;;  %487 = vmatprep.subr.bf16.mxu0 %v486_v3  ;;  %461 = vmatprep.mubr.msk.f32.mxu0 %vm116_vm0, %v110_v9  ;;  %v292_v11 = vld [vmem:[#allocation11 + $0x8] sm:$0xff]  ;;  %v204_v12 = vld [vmem:[#allocation10 + $0x10] sm:$0xff]  ;;  %v205_v13 = vld [vmem:[#allocation10 + $0x18] sm:$0xff]  ;;  %p654_p6 = scmp.ne.s32.totalorder %s384_s9, %s653_s13  ;;  %p658_p7 = scmp.lt.s32.totalorder %s384_s9, %s384_s9 }
  0x71   :  { %489 = vmatpush3.bf16.msra.mxu0 %v486_v3  ;;  %v498_v14 = vpack.c.bf16 %v205_v13, %v204_v12  ;;  %v200_v15 = vld [vmem:[#allocation5] sm:$0xff]  ;;  %v502_v16 = vpack.c.bf16 %v292_v11, %v291_v10  ;;  %v293_v17 = vld [vmem:[#allocation11 + $0x10] sm:$0xff]  ;;  %v294_v18 = vld [vmem:[#allocation11 + $0x18] sm:$0xff]  ;;  %p659_p8 = scmp.lt.s32.totalorder %s653_s13, %s653_s13 }
  0x72   :  { %495 = vmatprep.subr.bf16.mxu1 %v494_v8  ;;  %491 = vmatprep.subr.bf16.mxu0 %v490_v7  ;;  %v111_v19 = vld [vmem:[#allocation2 + $0x8] sm:$0xff]  ;;  %v506_v20 = vpack.c.bf16 %v294_v18, %v293_v17  ;;  %v201_v21 = vld [vmem:[#allocation5 + $0x8] sm:$0xff]  ;;  %v289_v22 = vld [vmem:[#allocation7] sm:$0xff] }
  0x73   :  { %497 = vmatpush3.bf16.msra.mxu1 %v494_v8  ;;  %472 = vmatprep.mubr.msk.f32.mxu1 %vm116_vm0, %v200_v15  ;;  %v290_v23 = vld [vmem:[#allocation7 + $0x8] sm:$0xff]  ;;  %p660_p9 = por %p659_p8, %p658_p7 }
  0x74   :  { %499 = vmatprep.subr.bf16.mxu1 %v498_v14 }
  0x75   :  { %493 = vmatpush3.bf16.msra.mxu0 %v490_v7  ;;  %p661_p10 = pnand %p660_p9, %p654_p6 }
  0x76   :  { %503 = vmatprep.subr.bf16.mxu0 %v502_v16 }
  0x77   :  { %501 = vmatpush3.bf16.msra.mxu1 %v498_v14 }
  0x78   :  { %462 = vmatmul.mubr.msk.f32.vlgmr.msra.gmra.mrb[0].mxu0 %vm116_vm0, %v111_v19 }
  0x79   :  { %505 = vmatpush3.bf16.msra.mxu0 %v502_v16  ;;  %483 = vmatprep.mubr.msk.f32.mxu0 %vm116_vm0, %v289_v22 }
  0x7a   :  { %473 = vmatmul.mubr.msk.f32.vlgmr.msra.gmra.mrb[0].mxu1 %vm116_vm0, %v201_v21  ;;  %507 = vmatprep.subr.bf16.mxu0 %v506_v20 }
  0x7d   :  { %509 = vmatpush3.bf16.msra.mxu0 %v506_v20 }
  0x80   :  { %484 = vmatmul.mubr.msk.f32.vlgmr.msra.gmra.mrb[2].mxu0 %vm116_vm0, %v290_v23 }
 0x14b   :  { %v463_v24 = vpop.f32.mrb[0].mxu0 }
 0x14c   :  { %199 = vst.msk [vmem:[#allocation13 + $0x8] sm:$0xff] %vm116_vm0, %v463_v24  ;;  %v189_v25 = vpop.f32.mrb[1].mxu0 }
 0x14d   :  { %v474_v26 = vpop.f32.mrb[0].mxu1  ;;  %198 = vst.msk [vmem:[#allocation13] sm:$0xff] %vm116_vm0, %v189_v25 }
 0x14e   :  { %288 = vst.msk [vmem:[#allocation14 + $0x8] sm:$0xff] %vm116_vm0, %v474_v26  ;;  %v278_v27 = vpop.f32.mrb[1].mxu1 }
 0x14f   :  { %287 = vst.msk [vmem:[#allocation14] sm:$0xff] %vm116_vm0, %v278_v27 }
 0x150   :  { %664 = shalt.err (!%p661_p10)
}
 0x151   :  { %s665_s16 = scalar_lea.hbm %s968_s6, 256 }
 0x152   :  { %p666_p11 = scmp.ne.s32.totalorder %s968_s6, %s665_s16  ;;  %p669_p12 = scmp.lt.u32.totalorder %s665_s16, %s968_s6 }
 0x154   :  { %p671_p13 = pnand %p669_p12, %p666_p11 }
 0x156   :  { %674 = shalt.err (!%p671_p13)
}
 0x157   :  { %389 = dma.vmem_to_hbm [thread:$0]  %s384_s9, 256, %s968_s6, [#allocation4], %s733_s17, %s733_s17, %s734_s18  }
 0x158   :  { %s675_s12 = scalar_lea.vmem %s905_s11, 256  ;;  %p680_p1 = scmp.lt.s32.totalorder %s905_s11, %s905_s11 }
 0x159   :  { %p676_p0 = scmp.ne.s32.totalorder %s905_s11, %s675_s12  ;;  %p681_p2 = scmp.lt.s32.totalorder %s675_s12, %s675_s12 }
 0x15b   :  { %p682_p3 = por %p681_p2, %p680_p1 }
 0x15d   :  { %p683_p4 = pnand %p682_p3, %p676_p0 }
 0x15f   :  { %686 = shalt.err (!%p683_p4)
}
 0x160   :  { %s687_s24 = scalar_lea.hbm %s969_s7, 256 }
 0x161   :  { %p688_p5 = scmp.ne.s32.totalorder %s969_s7, %s687_s24  ;;  %p691_p6 = scmp.lt.u32.totalorder %s687_s24, %s969_s7 }
 0x163   :  { %p693_p7 = pnand %p691_p6, %p688_p5 }
 0x165   :  { %696 = shalt.err (!%p693_p7)
}
 0x166   :  { %401 = dma.vmem_to_hbm [thread:$0]  %s905_s11, 256, %s969_s7, [#allocation15], %s733_s17, %s733_s17, %s734_s18   ;;  %v485_v28 = vpop.f32.mrb[2].mxu0 }
 0x167   :  { %s741_s28 = smov [#allocation16]   ;;  %377 = vst.msk [vmem:[#allocation16 + $0x8] sm:$0xff] %vm116_vm0, %v485_v28  ;;  %v367_v29 = vpop.f32.mrb[3].mxu0 }
 0x168   :  { %s407_s4 = sshll.u32 %s741_s28, 4  ;;  %376 = vst.msk [vmem:[#allocation16] sm:$0xff] %vm116_vm0, %v367_v29  ;;  %s408_s4 = int_to_ptr.vmem [resolvable:$true] %s407_s4 }
 0x169   :  { %s697_s0 = scalar_lea.vmem %s408_s4, 256  ;;  %p702_p9 = scmp.lt.s32.totalorder %s408_s4, %s408_s4 }
 0x16a   :  { %p698_p8 = scmp.ne.s32.totalorder %s408_s4, %s697_s0  ;;  %p703_p10 = scmp.lt.s32.totalorder %s697_s0, %s697_s0 }
 0x16c   :  { %p704_p11 = por %p703_p10, %p702_p9 }
 0x16e   :  { %p705_p12 = pnand %p704_p11, %p698_p8 }
 0x170   :  { %708 = shalt.err (!%p705_p12)
}
 0x171   :  { %s709_s7 = scalar_lea.hbm %s970_s8, 256 }
 0x172   :  { %p710_p13 = scmp.ne.s32.totalorder %s970_s8, %s709_s7  ;;  %p713_p0 = scmp.lt.u32.totalorder %s709_s7, %s970_s8 }
 0x174   :  { %p715_p1 = pnand %p713_p0, %p710_p13 }
 0x176   :  { %718 = shalt.err (!%p715_p1)
}
 0x177   :  { %413 = dma.vmem_to_hbm [thread:$0]  %s408_s4, 256, %s970_s8, [#allocation15], %s733_s17, %s733_s17, %s734_s18  }
 0x178   :  { %727 = dma.done.wait [#allocation4], 256  }
 0x179   :  { %728 = vsyncadd [#allocation4], 4294967040 }
 0x17a   :  { %729 = dma.done.wait [#allocation15], 512  }
 0x17b   :  { %730 = vsyncadd [#allocation15], 4294966784 }
 0x17c   :  { %423 = vsyncpa [#allocation3], 1 }
 0x17d   :  { %424 = vsyncpa [#allocation6], 1 }
 0x17e   :  { %425 = vsyncpa [#allocation9], 1 }
 0x17f   :  { %426 = vsyncpa [#allocation12], 1 }
 0x180   :  { %427 = vsyncpa [#allocation4], 1 }
 0x181   :  { %428 = vsyncpa [#allocation15], 1 }

</bundles_post_ra>
